<compile_context>
chip_gen: v7x
topology: tpu7x:2x2x1
jax: 0.10.0
libtpu: 0.0.40
codegen_flags: <defaults>
</compile_context>

<pallas_src>
import functools

import jax
import jax.numpy as jnp
from jax.experimental import pallas as pl
from jax.experimental.pallas import tpu as pltpu

# Set to jnp.bfloat16 on v6e/v7x at scale (see per-chip notes above).
CONV_OPERAND_DTYPE = jnp.float32


# ----------------------------------------------------------------------------
# Kernel 1: conv-as-matmul (3x3, pad=1) + bias + ReLU + global-average-pool.
# Grid = (image, row_tile); the row-tile axis is a reduction accumulated in a
# VMEM scratch, finalized (divide by HW) and stored on the last tile.
#   patches_ref : [1, TILE_ROWS, K]   (K = 9*C, unpadded)
#   wc_ref      : [K, F]    bc_ref : [1, F]
#   feat_ref    : [1, 1, F] (one image's features)
#   acc_ref     : [1, F]    VMEM scratch (per-image partial GAP sum)
# ----------------------------------------------------------------------------
def conv_gap_kernel(patches_ref, wc_ref, bc_ref, feat_ref, acc_ref, *, inv_hw):
    t = pl.program_id(1)

    @pl.when(t == 0)
    def _():
        acc_ref[...] = jnp.zeros_like(acc_ref)

    # Conv over this row tile on the MXU; bias + ReLU on the VPU.
    y = jnp.dot(patches_ref[0], wc_ref[...], preferred_element_type=jnp.float32)
    y = jnp.maximum(y + bc_ref[...], 0.0)

    # Partial GAP sum: sublane reduction goes to the XLU (a free slot here),
    # replacing the old block-diagonal [N, N*HW] matmul and its HBM input.
    acc_ref[...] += jnp.sum(y, axis=0, keepdims=True)

    @pl.when(t == pl.num_programs(1) - 1)
    def _():
        feat_ref[0] = acc_ref[...] * inv_hw  # sum-then-divide, matches jnp.mean


# ----------------------------------------------------------------------------
# Kernel 2: embedding head on the tiny [N, F] features (single block).
#   feat_ref: [N, F]   w1: [F, F]   b1: [1, F]   w2: [F, E_pad]   b2: [1, E_pad]
#   emb_ref : [N, E_pad]
# Padded w2/b2 columns are exactly zero, so padded emb columns are zero and the
# GLOBAL Frobenius norm equals the unpadded one (invariant holds by
# construction: padding is done with jnp.pad in the wrapper right below).
# ----------------------------------------------------------------------------
def head_kernel(feat_ref, w1_ref, b1_ref, w2_ref, b2_ref, emb_ref):
    feats = feat_ref[...]
    h = jnp.tanh(
        jnp.dot(feats, w1_ref[...], preferred_element_type=jnp.float32)
        + b1_ref[...]
    )
    emb = jnp.dot(h, w2_ref[...], preferred_element_type=jnp.float32) + b2_ref[...]
    # torch.norm(emb) with no dim -> Frobenius norm over the whole tensor.
    # rsqrt + multiply keeps the transcendental on the EUP slot.
    inv_norm = jax.lax.rsqrt(jnp.sum(emb * emb))
    emb_ref[...] = emb * inv_norm


def _vmem_spec():
    return pl.BlockSpec(memory_space=pltpu.MemorySpace.VMEM)


def _im2col_3x3(x_nhwc):
    """3x3 (pad=1) patches -> [N, H*W, 9*C], patch order (dy, dx, c)."""
    n, h, w, c = x_nhwc.shape
    xp = jnp.pad(x_nhwc, ((0, 0), (1, 1), (1, 1), (0, 0)))
    cols = []
    for dy in range(3):
        for dx in range(3):
            cols.append(xp[:, dy:dy + h, dx:dx + w, :])
    patches = jnp.concatenate(cols, axis=-1)          # [N, H, W, 9*C]
    return patches.reshape(n, h * w, 9 * c)


def image_embedding_forward(x_nchw, params, *, tile_rows=128):
    """Full forward pass. Returns (features, img_embedding) like the nn.Module."""
    n, c, h, w = x_nchw.shape
    hw = h * w
    x_nhwc = jnp.transpose(x_nchw, (0, 2, 3, 1))      # NCHW -> NHWC
    patches = _im2col_3x3(x_nhwc)                     # [N, HW, K], K unpadded

    k = patches.shape[-1]
    f_dim = params["w_conv"].shape[1]
    e_dim = params["w2"].shape[1]

    tile_rows = min(tile_rows, hw)
    assert hw % tile_rows == 0 and tile_rows % 8 == 0, (hw, tile_rows)
    num_tiles = hw // tile_rows

    patches = patches.astype(CONV_OPERAND_DTYPE)
    wc = params["w_conv"].astype(CONV_OPERAND_DTYPE)
    bc = params["b_conv"]

    cost = pl.CostEstimate(
        flops=2 * n * hw * k * f_dim + 2 * n * hw * f_dim,
        transcendentals=0,
        bytes_accessed=(patches.size * patches.dtype.itemsize
                        + wc.size * wc.dtype.itemsize
                        + bc.size * 4 + n * f_dim * 4),
    )

    feats = pl.pallas_call(
        functools.partial(conv_gap_kernel, inv_hw=1.0 / float(hw)),
        out_shape=jax.ShapeDtypeStruct((n, 1, f_dim), jnp.float32),
        grid_spec=pltpu.PrefetchScalarGridSpec(
            num_scalar_prefetch=0,
            grid=(n, num_tiles),                      # reduction axis last
            in_specs=[
                pl.BlockSpec((1, tile_rows, k), lambda b, t: (b, t, 0)),
                pl.BlockSpec((k, f_dim), lambda b, t: (0, 0)),
                pl.BlockSpec((1, f_dim), lambda b, t: (0, 0)),
            ],
            out_specs=pl.BlockSpec((1, 1, f_dim), lambda b, t: (b, 0, 0)),
            scratch_shapes=[pltpu.VMEM((1, f_dim), jnp.float32)],
        ),
        compiler_params=pltpu.CompilerParams(
            dimension_semantics=("parallel", "arbitrary"),
            vmem_limit_bytes=32 * 1024 * 1024,  # safe on v5e/v6e/v7x; tiles are tiny
        ),
        cost_estimate=cost,
    )(patches, wc, bc)
    features = feats.reshape(n, f_dim)

    # Embedding head: pad only the tiny E dim (2 -> 128) to a lane-dense width.
    # Padded columns are exactly zero => global norm unchanged (see kernel 2).
    e_pad = 128
    w2_p = jnp.pad(params["w2"], ((0, 0), (0, e_pad - e_dim)))
    b2_p = jnp.pad(params["b2"], ((0, 0), (0, e_pad - e_dim)))

    emb_p = pl.pallas_call(
        head_kernel,
        out_shape=jax.ShapeDtypeStruct((n, e_pad), jnp.float32),
        in_specs=[_vmem_spec() for _ in range(5)],
        out_specs=_vmem_spec(),
    )(features, params["w1"], params["b1"], w2_p, b2_p)
    img_embedding = emb_p[:, :e_dim]

    return features, img_embedding


def make_params(key, in_channels, num_ftrs, embed_dim):
    ks = jax.random.split(key, 6)
    k_patch = 9 * in_channels
    return {
        # conv weight already laid out as [9*C, F] to match im2col patch order
        "w_conv": jax.random.normal(ks[0], (k_patch, num_ftrs), jnp.float32) * 0.1,
        "b_conv": jax.random.normal(ks[1], (1, num_ftrs), jnp.float32) * 0.01,
        "w1": jax.random.normal(ks[2], (num_ftrs, num_ftrs), jnp.float32) * 0.1,
        "b1": jax.random.normal(ks[3], (1, num_ftrs), jnp.float32) * 0.01,
        "w2": jax.random.normal(ks[4], (num_ftrs, embed_dim), jnp.float32) * 0.1,
        "b2": jax.random.normal(ks[5], (1, embed_dim), jnp.float32) * 0.01,
    }


def _reference_forward(x_nchw, params):
    """Pure-JAX reference for correctness checking."""
    x_nhwc = jnp.transpose(x_nchw, (0, 2, 3, 1))
    patches = _im2col_3x3(x_nhwc)                       # [N, HW, K]
    y = jnp.maximum(patches @ params["w_conv"] + params["b_conv"], 0.0)
    features = jnp.mean(y, axis=1)
    h = jnp.tanh(features @ params["w1"] + params["b1"])
    e = h @ params["w2"] + params["b2"]
    return features, e / jnp.sqrt(jnp.sum(e * e))


if __name__ == "__main__":
    # Small shapes consistent with the module: batch=2, channels=4, spatial=16.
    N, C, H, W = 2, 4, 16, 16
    NUM_FTRS = 32                       # convnet.fc.in_features
    # label_embeddings would be a [num_classes, emb_size] table -> .dim() == 2
    LABEL_EMBEDDINGS_RANK = 2           # faithful to the PyTorch quirk
    EMBED_DIM = LABEL_EMBEDDINGS_RANK

    key = jax.random.PRNGKey(0)
    kx, kp = jax.random.split(key)
    x = jax.random.normal(kx, (N, C, H, W), jnp.float32)   # NCHW like PyTorch
    params = make_params(kp, C, NUM_FTRS, EMBED_DIM)

    features, img_embedding = jax.jit(image_embedding_forward)(x, params)
    features = jax.block_until_ready(features)
    img_embedding = jax.block_until_ready(img_embedding)

    ref_feat, ref_emb = _reference_forward(x, params)
    assert features.shape == (N, NUM_FTRS)
    assert img_embedding.shape == (N, EMBED_DIM)
    assert jnp.allclose(features, ref_feat, atol=1e-4, rtol=1e-4)
    assert jnp.allclose(img_embedding, ref_emb, atol=1e-4, rtol=1e-4)

    print("KERNEL_OK")
</pallas_src>

<mosaic_0001>
module attributes {stable_mosaic.version = 11 : i64} {
  func.func @conv_gap_kernel(%arg0: i32, %arg1: i32, %arg2: memref<1x128x36xf32, #tpu.memory_space<vmem>>, %arg3: memref<36x32xf32, #tpu.memory_space<vmem>>, %arg4: memref<1x32xf32, #tpu.memory_space<vmem>>, %arg5: memref<1x1x32xf32, #tpu.memory_space<vmem>>, %arg6: memref<1x32xf32, #tpu.memory_space<vmem>>) attributes {dimension_semantics = [#tpu.dimension_semantics<parallel>, #tpu.dimension_semantics<arbitrary>], iteration_bounds = array<i64: 2, 2>, scalar_prefetch = 0 : i64, scratch_operands = 1 : i64, tpu.core_type = #tpu.core_type<tc>, window_params = [{transform_indices = @transform_0, window_bounds = array<i64: 1, 128, 36>}, {pipeline_mode = #tpu.pipeline_mode<synchronous>, transform_indices = @transform_1, window_bounds = array<i64: 36, 32>}, {pipeline_mode = #tpu.pipeline_mode<synchronous>, transform_indices = @transform_2, window_bounds = array<i64: 1, 32>}, {transform_indices = @transform_3, window_bounds = array<i64: 1, 1, 32>}]} {
    %c0_i32 = arith.constant 0 : i32
    %0 = arith.cmpi eq, %arg1, %c0_i32 : i32
    %1 = arith.extui %0 : i1 to i32
    %c0_i32_0 = arith.constant 0 : i32
    %2 = arith.cmpi ne, %1, %c0_i32_0 : i32
    scf.if %2 {
      %cst_14 = arith.constant 0.000000e+00 : f32
      %20 = vector.broadcast %cst_14 : f32 to vector<1x32xf32>
      %c0_15 = arith.constant 0 : index
      %c0_16 = arith.constant 0 : index
      %21 = vector.load %arg6[%c0_15, %c0_16] : memref<1x32xf32, #tpu.memory_space<vmem>>, vector<1x32xf32>
      tpu.vector_store %arg6[%c0_15, %c0_16], %20 {strides = array<i32>} : memref<1x32xf32, #tpu.memory_space<vmem>>, vector<1x32xf32>,
    } else {
    }
    %c0 = arith.constant 0 : index
    %c0_1 = arith.constant 0 : index
    %c0_2 = arith.constant 0 : index
    %3 = vector.load %arg2[%c0, %c0_1, %c0_2] : memref<1x128x36xf32, #tpu.memory_space<vmem>>, vector<1x128x36xf32>
    %4 = vector.shape_cast %3 : vector<1x128x36xf32> to vector<128x36xf32>
    %c0_3 = arith.constant 0 : index
    %c0_4 = arith.constant 0 : index
    %5 = vector.load %arg3[%c0_3, %c0_4] : memref<36x32xf32, #tpu.memory_space<vmem>>, vector<36x32xf32>
    %cst = arith.constant dense<0.000000e+00> : vector<128x32xf32>
    %6 = tpu.matmul %4, %5, %cst {dimension_numbers = #tpu.dot_dimension_numbers<[1], [0], [0], [1], [0, 0, 1, 1], [], []>} : vector<128x36xf32>, vector<36x32xf32>, vector<128x32xf32> -> vector<128x32xf32>
    %c0_5 = arith.constant 0 : index
    %c0_6 = arith.constant 0 : index
    %7 = vector.load %arg4[%c0_5, %c0_6] : memref<1x32xf32, #tpu.memory_space<vmem>>, vector<1x32xf32>
    %8 = vector.broadcast %7 : vector<1x32xf32> to vector<128x32xf32>
    %9 = arith.addf %6, %8 : vector<128x32xf32>
    %cst_7 = arith.constant 0.000000e+00 : f32
    %10 = vector.broadcast %cst_7 : f32 to vector<128x32xf32>
    %11 = arith.maximumf %9, %10 : vector<128x32xf32>
    %c0_8 = arith.constant 0 : index
    %c0_9 = arith.constant 0 : index
    %12 = vector.load %arg6[%c0_8, %c0_9] : memref<1x32xf32, #tpu.memory_space<vmem>>, vector<1x32xf32>
    %cst_10 = arith.constant dense<0.000000e+00> : vector<32xf32>
    %13 = vector.multi_reduction <add>, %11, %cst_10 [0] : vector<128x32xf32> to vector<32xf32>
    %14 = vector.shape_cast %13 : vector<32xf32> to vector<1x32xf32>
    %15 = arith.addf %12, %14 : vector<1x32xf32>
    %c0_11 = arith.constant 0 : index
    %c0_12 = arith.constant 0 : index
    %16 = vector.load %arg6[%c0_11, %c0_12] : memref<1x32xf32, #tpu.memory_space<vmem>>, vector<1x32xf32>
    tpu.vector_store %arg6[%c0_11, %c0_12], %15 {strides = array<i32>} : memref<1x32xf32, #tpu.memory_space<vmem>>, vector<1x32xf32>,
    %c1_i32 = arith.constant 1 : i32
    %17 = arith.cmpi eq, %arg1, %c1_i32 : i32
    %18 = arith.extui %17 : i1 to i32
    %c0_i32_13 = arith.constant 0 : i32
    %19 = arith.cmpi ne, %18, %c0_i32_13 : i32
    scf.if %19 {
      %c0_14 = arith.constant 0 : index
      %c0_15 = arith.constant 0 : index
      %20 = vector.load %arg6[%c0_14, %c0_15] : memref<1x32xf32, #tpu.memory_space<vmem>>, vector<1x32xf32>
      %cst_16 = arith.constant 3.906250e-03 : f32
      %21 = vector.broadcast %cst_16 : f32 to vector<1x32xf32>
      %22 = arith.mulf %20, %21 : vector<1x32xf32>
      %c0_17 = arith.constant 0 : index
      %c0_18 = arith.constant 0 : index
      %c0_19 = arith.constant 0 : index
      %23 = vector.load %arg5[%c0_17, %c0_18, %c0_19] : memref<1x1x32xf32, #tpu.memory_space<vmem>>, vector<1x1x32xf32>
      %24 = vector.shape_cast %23 : vector<1x1x32xf32> to vector<1x32xf32>
      %25 = vector.shape_cast %22 : vector<1x32xf32> to vector<1x1x32xf32>
      tpu.vector_store %arg5[%c0_17, %c0_18, %c0_19], %25 {strides = array<i32>} : memref<1x1x32xf32, #tpu.memory_space<vmem>>, vector<1x1x32xf32>,
    } else {
    }
    return
  }
  func.func @transform_0(%arg0: i32, %arg1: i32) -> (i32, i32, i32) {
    %c0_i32 = arith.constant 0 : i32
    %c0_i32_0 = arith.constant 0 : i32
    return %arg0, %arg1, %c0_i32 : i32, i32, i32
  }
  func.func @transform_1(%arg0: i32, %arg1: i32) -> (i32, i32) {
    %c0_i32 = arith.constant 0 : i32
    %c0_i32_0 = arith.constant 0 : i32
    %c0_i32_1 = arith.constant 0 : i32
    return %c0_i32, %c0_i32_0 : i32, i32
  }
  func.func @transform_2(%arg0: i32, %arg1: i32) -> (i32, i32) {
    %c0_i32 = arith.constant 0 : i32
    %c0_i32_0 = arith.constant 0 : i32
    %c0_i32_1 = arith.constant 0 : i32
    return %c0_i32, %c0_i32_0 : i32, i32
  }
  func.func @transform_3(%arg0: i32, %arg1: i32) -> (i32, i32, i32) {
    %c0_i32 = arith.constant 0 : i32
    %c0_i32_0 = arith.constant 0 : i32
    %c0_i32_1 = arith.constant 0 : i32
    return %arg0, %c0_i32, %c0_i32_0 : i32, i32, i32
  }
}

module attributes {stable_mosaic.version = 11 : i64} {
  func.func @head_kernel(%arg0: memref<2x32xf32, #tpu.memory_space<vmem>>, %arg1: memref<32x32xf32, #tpu.memory_space<vmem>>, %arg2: memref<1x32xf32, #tpu.memory_space<vmem>>, %arg3: memref<32x128xf32, #tpu.memory_space<vmem>>, %arg4: memref<1x128xf32, #tpu.memory_space<vmem>>, %arg5: memref<2x128xf32, #tpu.memory_space<vmem>>) attributes {dimension_semantics = [], scalar_prefetch = 0 : i64, scratch_operands = 0 : i64, tpu.core_type = #tpu.core_type<tc>} {
    %c0 = arith.constant 0 : index
    %c0_0 = arith.constant 0 : index
    %0 = vector.load %arg0[%c0, %c0_0] : memref<2x32xf32, #tpu.memory_space<vmem>>, vector<2x32xf32>
    %c0_1 = arith.constant 0 : index
    %c0_2 = arith.constant 0 : index
    %1 = vector.load %arg1[%c0_1, %c0_2] : memref<32x32xf32, #tpu.memory_space<vmem>>, vector<32x32xf32>
    %cst = arith.constant dense<0.000000e+00> : vector<2x32xf32>
    %2 = tpu.matmul %0, %1, %cst {dimension_numbers = #tpu.dot_dimension_numbers<[1], [0], [0], [1], [0, 0, 1, 1], [], []>} : vector<2x32xf32>, vector<32x32xf32>, vector<2x32xf32> -> vector<2x32xf32>
    %c0_3 = arith.constant 0 : index
    %c0_4 = arith.constant 0 : index
    %3 = vector.load %arg2[%c0_3, %c0_4] : memref<1x32xf32, #tpu.memory_space<vmem>>, vector<1x32xf32>
    %4 = vector.broadcast %3 : vector<1x32xf32> to vector<2x32xf32>
    %5 = arith.addf %2, %4 : vector<2x32xf32>
    %6 = math.tanh %5 : vector<2x32xf32>
    %c0_5 = arith.constant 0 : index
    %c0_6 = arith.constant 0 : index
    %7 = vector.load %arg3[%c0_5, %c0_6] : memref<32x128xf32, #tpu.memory_space<vmem>>, vector<32x128xf32>
    %cst_7 = arith.constant dense<0.000000e+00> : vector<2x128xf32>
    %8 = tpu.matmul %6, %7, %cst_7 {dimension_numbers = #tpu.dot_dimension_numbers<[1], [0], [0], [1], [0, 0, 1, 1], [], []>} : vector<2x32xf32>, vector<32x128xf32>, vector<2x128xf32> -> vector<2x128xf32>
    %c0_8 = arith.constant 0 : index
    %c0_9 = arith.constant 0 : index
    %9 = vector.load %arg4[%c0_8, %c0_9] : memref<1x128xf32, #tpu.memory_space<vmem>>, vector<1x128xf32>
    %10 = vector.broadcast %9 : vector<1x128xf32> to vector<2x128xf32>
    %11 = arith.addf %8, %10 : vector<2x128xf32>
    %12 = arith.mulf %11, %11 : vector<2x128xf32>
    %13 = vector.shape_cast %12 : vector<2x128xf32> to vector<1x2x128xf32>
    %cst_10 = arith.constant dense<0.000000e+00> : vector<1xf32>
    %14 = vector.multi_reduction <add>, %13, %cst_10 [1, 2] : vector<1x2x128xf32> to vector<1xf32>
    %15 = vector.shape_cast %14 : vector<1xf32> to vector<1x1x1xf32>
    %16 = vector.extract %15[0, 0, 0] : f32 from vector<1x1x1xf32>
    %17 = math.rsqrt %16 : f32
    %18 = vector.broadcast %17 : f32 to vector<2x128xf32>
    %19 = arith.mulf %11, %18 : vector<2x128xf32>
    %c0_11 = arith.constant 0 : index
    %c0_12 = arith.constant 0 : index
    %20 = vector.load %arg5[%c0_11, %c0_12] : memref<2x128xf32, #tpu.memory_space<vmem>>, vector<2x128xf32>
    tpu.vector_store %arg5[%c0_11, %c0_12], %19 {strides = array<i32>} : memref<2x128xf32, #tpu.memory_space<vmem>>, vector<2x128xf32>,
    return
  }
}

</mosaic_0001>

<bundles_post_ra>
// kernel: image_embedding_forward.2
= control target key start
LH: loop header
LB: loop body
LE: loop exit
PB: predicated region body
PF: predicated region fallthrough
CT: control target
= control target key end

     0   :  { %s757_s12 = smov 0   ;;  %s759_s13 = smov 0   ;;  %s908_s0 = inlined_call_operand.vmem [shape: f32[2,256,36], index: 0, kind: input, shape index: {}]   ;;  %s909_s1 = inlined_call_operand.vmem [shape: f32[36,32], index: 1, kind: input, shape index: {}]   ;;  %s910_s2 = inlined_call_operand.vmem [shape: f32[1,32], index: 2, kind: input, shape index: {}]   ;;  %s911_s3 = inlined_call_operand.vmem [shape: f32[2,1,32], index: 3, kind: output, shape index: {}]  }
   0x1   :  { %s761_s14 = smov 0   ;;  %s763_s15 = smov 0  }
   0x2   :  { %s765_s16 = smov 0  }
   0x3 LB: > { %s22_s17 = sadd.s32 1, %s726_s14  ;;  %s25_s18 = sadd.s32 1, %s730_s15  ;;  %s734_s16 = sphi %s765_s16, %s13_s16   ;;  %s730_s15 = sphi %s763_s15, %s915_s15   ;;  %s726_s14 = sphi %s761_s14, %s914_s14   ;;  %s722_s13 = sphi %s759_s13, %s913_s13   ;;  %s718_s12 = sphi %s757_s12, %s912_s12  }
   0x4   : > { %p23_p0 = scmp.ge.s32.totalorder %s22_s17, 2  ;;  %p560_p1 = scmp.ge.s32.totalorder %s734_s16, 1 }
   0x5   : > { %p156_p2 = scmp.lt.s32.totalorder %s734_s16, 5 }
   0x6   : > { %s917_s17 = smov (%p23_p0, %s22_s17), 0  ;;  %s919_s18 = smov (!%p23_p0, %s25_s18), %s730_s15 }
   0x7   : > { %p157_p3 = pnand %p560_p1, %p156_p2  ;;  %p27_p4 = scmp.ge.s32.totalorder %s919_s18, 2 }
   0x8   : > { %s561_s19 = sshll.u32 (!%p157_p3), %s718_s12, 4  ;;  %p183_p5 = scmp.lt.s32.totalorder (!%p157_p3), %s722_s13, 1 }
   0x9   : > { %s921_s18 = smov (%p27_p4, %s919_s18), 0  ;;  %160 = sbr.rel (%p157_p3) target bundleno = 313 (0x139), region = 32 }
   0xa   : > { %p185_p6 = scmp.lt.s32.totalorder (!%p157_p3), %s561_s19, 31  ;;  %p564_p7 = scmp.ne.s32.totalorder (!%p157_p3), %s718_s12, 0 }
  0x10   : > { %s923_s13 = smov (!%p183_p5, %s722_s13), 1  ;;  %s925_s19 = smov (!%p185_p6, %s561_s19), 31 }
  0x11   : > { %s562_s20 = sshll.u32 %s923_s13, 5  ;;  %s194_s23 = scalar_lea.vmem %s911_s3, %s923_s13  ;;  %vm199_vm0 = vcmask (!%p564_p7), 253952   ;;  %v736_v0 = vmov (!%p564_p7), 0.0  }
  0x12   : > { %s188_s24 = sadd.s32 %s562_s20, %s925_s19  ;;  %198 = sbr.rel (%p564_p7) target bundleno = 25 (0x19), region = 36  ;;  %200 = vst.msk [vmem:[#allocation2] sm:$0x1] (!%p564_p7), %vm199_vm0, %v736_v0 }
  0x13   : > { %s563_s25 = sshll.u32 %s188_s24, 3 }
  0x14   : > { %s800_s28 = scalar_lea.vmem %s908_s0, %s563_s25 }
  0x19 PF: > { %v217_v1 = vld [vmem:[%s909_s1] sm:$0xff]  ;;  %v218_v2 = vld [vmem:[%s909_s1 + $0x8] sm:$0xff]  ;;  %v219_v3 = vld [vmem:[%s909_s1 + $0x10] sm:$0xff]  ;;  %vm229_vm1 = vcmask 293888   ;;  %vm278_vm2 = vcmask 1043456   ;;  %vm444_vm3 = vcmask 261120  }
  0x1a   : > { %v641_v4 = vpack.c.bf16 %v218_v2, %v217_v1  ;;  %v220_v5 = vld [vmem:[%s909_s1 + $0x18] sm:$0xff]  ;;  %v201_v6 = vld [vmem:[%s800_s28] sm:$0xff]  ;;  %v202_v10 = vld [vmem:[%s800_s28 + $0x8] sm:$0xff]  ;;  %vm483_vm4 = vcmask 253952   ;;  %p583_p8 = scmp.ne.s32.totalorder %s718_s12, 1 }
  0x1b   : > { %v645_v7 = vpack.c.bf16 %v220_v5, %v219_v3  ;;  %617 = vmatprep.mubr.msk.f32.mxu0 %vm229_vm1, %v201_v6  ;;  %v209_v8 = vld [vmem:[%s800_s28 + $0x40] sm:$0xff]  ;;  %v210_v11 = vld [vmem:[%s800_s28 + $0x48] sm:$0xff]  ;;  %v203_v12 = vld [vmem:[%s800_s28 + $0x10] sm:$0xff] }
  0x1c   : > { %642 = vmatprep.subr.bf16.mxu0 %v641_v4  ;;  %649 = vmatprep.subr.bf16.mxu1 %v641_v4  ;;  %v221_v9 = vld [vmem:[%s909_s1 + $0x20] sm:$0xf]  ;;  %v211_v13 = vld [vmem:[%s800_s28 + $0x50] sm:$0xff]  ;;  %v204_v14 = vld [vmem:[%s800_s28 + $0x18] sm:$0xff] }
  0x1d   : > { %644 = vmatpush3.bf16.msra.mxu0 %v641_v4  ;;  %652 = vmatpush3.bf16.msra.mxu1 %v641_v4  ;;  %v212_v15 = vld [vmem:[%s800_s28 + $0x58] sm:$0xff]  ;;  %v205_v16 = vld [vmem:[%s800_s28 + $0x20] sm:$0xff]  ;;  %v206_v18 = vld [vmem:[%s800_s28 + $0x28] sm:$0xff] }
  0x1e   : > { %646 = vmatprep.subr.bf16.mxu0 %v645_v7  ;;  %650 = vmatprep.subr.bf16.mxu1 %v645_v7  ;;  %v213_v17 = vld [vmem:[%s800_s28 + $0x60] sm:$0xff]  ;;  %v214_v19 = vld [vmem:[%s800_s28 + $0x68] sm:$0xff]  ;;  %v207_v20 = vld [vmem:[%s800_s28 + $0x30] sm:$0xff] }
  0x1f   : > { %629 = vmatprep.mubr.msk.f32.mxu1 %vm229_vm1, %v209_v8  ;;  %v215_v21 = vld [vmem:[%s800_s28 + $0x70] sm:$0xff]  ;;  %v208_v22 = vld [vmem:[%s800_s28 + $0x38] sm:$0xff]  ;;  %v853_v24 = vld [vmem:[%s910_s2] ss:$0 sm:$0xff] }
  0x20   : > { %v216_v23 = vld [vmem:[%s800_s28 + $0x78] sm:$0xff] }
  0x21   : > { %648 = vmatpush3.bf16.msra.mxu0 %v645_v7  ;;  %653 = vmatpush3.bf16.msra.mxu1 %v645_v7 }
  0x22   : > { %615 = vmatprep.subr.msk.mxu0 %vm278_vm2, %v221_v9  ;;  %651 = vmatprep.subr.msk.mxu1 %vm278_vm2, %v221_v9 }
  0x25   : > { %616 = vmatpush3.msk.msra.mxu0 %vm278_vm2, %v221_v9  ;;  %654 = vmatpush3.msk.msra.mxu1 %vm278_vm2, %v221_v9 }
  0x26   : > { %618 = vmatmul.mubr.msk.f32.vlgmr.msra.gmra.mrb[0].mxu0 %vm229_vm1, %v202_v10  ;;  %630 = vmatmul.mubr.msk.f32.vlgmr.msra.gmra.mrb[0].mxu1 %vm229_vm1, %v210_v11 }
  0x27   : > { %620 = vmatprep.mubr.msk.f32.mxu0 %vm229_vm1, %v203_v12  ;;  %632 = vmatprep.mubr.msk.f32.mxu1 %vm229_vm1, %v211_v13 }
  0x2a   : > { %621 = vmatmul.mubr.msk.f32.gmra.mrb[2].mxu0 %vm229_vm1, %v204_v14  ;;  %633 = vmatmul.mubr.msk.f32.gmra.mrb[2].mxu1 %vm229_vm1, %v212_v15 }
  0x2b   : > { %623 = vmatprep.mubr.msk.f32.mxu0 %vm229_vm1, %v205_v16  ;;  %635 = vmatprep.mubr.msk.f32.mxu1 %vm229_vm1, %v213_v17 }
  0x2e   : > { %624 = vmatmul.mubr.msk.f32.gmra.mrb[4].mxu0 %vm229_vm1, %v206_v18  ;;  %636 = vmatmul.mubr.msk.f32.gmra.mrb[4].mxu1 %vm229_vm1, %v214_v19 }
  0x2f   : > { %626 = vmatprep.mubr.msk.f32.mxu0 %vm229_vm1, %v207_v20  ;;  %638 = vmatprep.mubr.msk.f32.mxu1 %vm229_vm1, %v215_v21 }
  0x32   : > { %627 = vmatmul.mubr.msk.f32.gmra.mrb[6].mxu0 %vm229_vm1, %v208_v22  ;;  %639 = vmatmul.mubr.msk.f32.gmra.mrb[6].mxu1 %vm229_vm1, %v216_v23 }
  0xf9   : > { %v619_v25 = vpop.f32.mrb[0].mxu0  ;;  %v631_v26 = vpop.f32.mrb[0].mxu1 }
  0xfa   : > { %v354_v27 = vadd.f32 %v619_v25, %v853_v24  ;;  %v348_v28 = vpop.f32.mrb[1].mxu0  ;;  %v388_v29 = vpop.f32.mrb[1].mxu1  ;;  %v394_v1 = vadd.f32 %v631_v26, %v853_v24 }
  0xfb   : > { %v349_v30 = vadd.f32 %v853_v24, %v348_v28  ;;  %v389_v52 = vadd.f32 %v853_v24, %v388_v29 }
  0xfc   : > { %v428_v31 = vmax.f32 %v354_v27, 0.0  ;;  %v436_v10 = vmax.f32 %v394_v1, 0.0 }
  0xfd   : > { %v427_v32 = vmax.f32 %v349_v30, 0.0  ;;  %v622_v33 = vpop.f32.mrb[2].mxu0  ;;  %v634_v34 = vpop.f32.mrb[2].mxu1  ;;  %v435_v2 = vmax.f32 %v389_v52, 0.0 }
  0xfe   : > { %v446_v35 = vsel %vm444_vm3, %v428_v31, 0.0  ;;  %v364_v36 = vadd.f32 %v622_v33, %v853_v24  ;;  %v358_v37 = vpop.f32.mrb[3].mxu0  ;;  %v398_v38 = vpop.f32.mrb[3].mxu1  ;;  %v404_v11 = vadd.f32 %v634_v34, %v853_v24  ;;  %v462_v17 = vsel %vm444_vm3, %v436_v10, 0.0 }
  0xff   : > { %v445_v39 = vsel %vm444_vm3, %v427_v32, 0.0  ;;  %v359_v40 = vadd.f32 %v853_v24, %v358_v37  ;;  %v399_v6 = vadd.f32 %v853_v24, %v398_v38  ;;  %v460_v13 = vsel %vm444_vm3, %v435_v2, 0.0 }
 0x100   : > { %v447_v41 = vadd.f32 %v446_v35, %v445_v39  ;;  %v430_v42 = vmax.f32 %v364_v36, 0.0  ;;  %v438_v19 = vmax.f32 %v404_v11, 0.0 }
 0x101   : > { %v429_v43 = vmax.f32 %v359_v40, 0.0  ;;  %v625_v44 = vpop.f32.mrb[4].mxu0  ;;  %v637_v45 = vpop.f32.mrb[4].mxu1  ;;  %v437_v14 = vmax.f32 %v399_v6, 0.0 }
 0x102   : > { %v374_v46 = vadd.f32 %v625_v44, %v853_v24  ;;  %v368_v47 = vpop.f32.mrb[5].mxu0  ;;  %v408_v48 = vpop.f32.mrb[5].mxu1  ;;  %v450_v53 = vsel %vm444_vm3, %v430_v42, 0.0  ;;  %v414_v21 = vadd.f32 %v637_v45, %v853_v24  ;;  %v466_v26 = vsel %vm444_vm3, %v438_v19, 0.0 }
 0x103   : > { %v448_v49 = vsel %vm444_vm3, %v429_v43, 0.0  ;;  %v369_v50 = vadd.f32 %v853_v24, %v368_v47  ;;  %v409_v15 = vadd.f32 %v853_v24, %v408_v48  ;;  %v464_v20 = vsel %vm444_vm3, %v437_v14, 0.0 }
 0x104   : > { %v449_v51 = vadd.f32 %v448_v49, %v447_v41  ;;  %v432_v54 = vmax.f32 %v374_v46, 0.0  ;;  %v440_v28 = vmax.f32 %v414_v21, 0.0  ;;  %v443_v46 = vld [vmem:[#allocation2] sm:$0x1] }
 0x105   : > { %v431_v55 = vmax.f32 %v369_v50, 0.0  ;;  %v628_v56 = vpop.f32.mrb[6].mxu0  ;;  %v640_v57 = vpop.f32.mrb[6].mxu1  ;;  %v439_v22 = vmax.f32 %v409_v15, 0.0 }
 0x106   : > { %v451_v58 = vadd.f32 %v450_v53, %v449_v51  ;;  %v384_v59 = vadd.f32 %v628_v56, %v853_v24  ;;  %v378_v60 = vpop.f32.mrb[7].mxu0  ;;  %v418_v61 = vpop.f32.mrb[7].mxu1  ;;  %v454_v3 = vsel %vm444_vm3, %v432_v54, 0.0  ;;  %v424_v30 = vadd.f32 %v640_v57, %v853_v24 }
 0x107   : > { %v452_v62 = vsel %vm444_vm3, %v431_v55, 0.0  ;;  %v379_v63 = vadd.f32 %v853_v24, %v378_v60  ;;  %v419_v23 = vadd.f32 %v853_v24, %v418_v61  ;;  %v468_v29 = vsel %vm444_vm3, %v439_v22, 0.0 }
 0x108   : > { %v453_v0 = vadd.f32 %v452_v62, %v451_v58  ;;  %v434_v4 = vmax.f32 %v384_v59, 0.0  ;;  %v470_v34 = vsel %vm444_vm3, %v440_v28, 0.0  ;;  %v442_v35 = vmax.f32 %v424_v30, 0.0 }
 0x109   : > { %v433_v5 = vmax.f32 %v379_v63, 0.0  ;;  %v441_v31 = vmax.f32 %v419_v23, 0.0 }
 0x10a   : > { %v455_v7 = vadd.f32 %v454_v3, %v453_v0  ;;  %v458_v12 = vsel %vm444_vm3, %v434_v4, 0.0  ;;  %v474_v39 = vsel %vm444_vm3, %v442_v35, 0.0 }
 0x10b   : > { %v456_v8 = vsel %vm444_vm3, %v433_v5, 0.0  ;;  %v472_v36 = vsel %vm444_vm3, %v441_v31, 0.0 }
 0x10c   : > { %v457_v9 = vadd.f32 %v456_v8, %v455_v7 }
 0x10e   : > { %v459_v16 = vadd.f32 %v458_v12, %v457_v9 }
 0x110   : > { %v461_v18 = vadd.f32 %v460_v13, %v459_v16 }
 0x112   : > { %v463_v25 = vadd.f32 %v462_v17, %v461_v18 }
 0x114   : > { %v465_v27 = vadd.f32 %v464_v20, %v463_v25 }
 0x116   : > { %v467_v32 = vadd.f32 %v466_v26, %v465_v27 }
 0x118   : > { %v469_v33 = vadd.f32 %v468_v29, %v467_v32 }
 0x11a   : > { %v471_v37 = vadd.f32 %v470_v34, %v469_v33 }
 0x11c   : > { %v473_v38 = vadd.f32 %v472_v36, %v471_v37 }
 0x11e   : > { %v475_v40 = vadd.f32 %v474_v39, %v473_v38 }
 0x120   : > { %v476_v41 = vrot.slane %v475_v40, 4 }
 0x122   : > { %v477_v42 = vadd.f32 %v476_v41, %v475_v40 }
 0x124   : > { %v478_v43 = vrot.slane %v477_v42, 2 }
 0x126   : > { %v479_v44 = vadd.f32 %v478_v43, %v477_v42 }
 0x128   : > { %v480_v45 = vrot.slane %v479_v44, 1  ;;  %488 = sbr.rel (%p583_p8) target bundleno = 313 (0x139), region = 40 }
 0x12a   : > { %v481_v24 = vadd.f32 %v480_v45, %v479_v44 }
 0x12c   : > { %v482_v47 = vadd.f32 %v481_v24, %v443_v46 }
 0x12e   : > { %484 = vst.msk [vmem:[#allocation2] sm:$0x1] %vm483_vm4, %v482_v47 }
 0x135   : > { %v489_v48 = vld [vmem:[#allocation2] sm:$0x1] }
 0x136   : > { %v490_v49 = vmul.f32 0.00390625, %v489_v48 }
 0x138   : > { %491 = vst.msk [vmem:[%s194_s23] sm:$0x1] %vm483_vm4, %v490_v49 }
 0x139 PF: > { %s13_s16 = sadd.s32 1, %s734_s16   ;;  %s912_s12 = smov %s726_s14 }
 0x13a   : > { %p10_p9 = scmp.ge.s32.totalorder %s13_s16, 6   ;;  %s913_s13 = smov %s730_s15 }
 0x13b   : > { %s914_s14 = smov %s917_s17  ;;  %s915_s15 = smov %s921_s18 }
 0x13c   :  { %12 = sbr.rel (!%p10_p9) target bundleno = 3 (0x3), region = 70 }

// kernel: image_embedding_forward.3
= control target key start
LH: loop header
LB: loop body
LE: loop exit
PB: predicated region body
PF: predicated region fallthrough
CT: control target
= control target key end

     0   :  { %v308_v3 = vmov 0.0|0.0   ;;  %vm309_vm0 = vmmov 0   ;;  %v310_v6 = vmov 0.0   ;;  %s389_s0 = inlined_call_operand.vmem [shape: f32[2,32], index: 0, kind: input, shape index: {}]   ;;  %s390_s1 = inlined_call_operand.vmem [shape: f32[32,32], index: 1, kind: input, shape index: {}]   ;;  %s391_s2 = inlined_call_operand.vmem [shape: f32[1,32], index: 2, kind: input, shape index: {}]   ;;  %s392_s3 = inlined_call_operand.vmem [shape: f32[32,128], index: 3, kind: input, shape index: {}]   ;;  %s393_s4 = inlined_call_operand.vmem [shape: f32[1,128], index: 4, kind: input, shape index: {}]   ;;  %s394_s5 = inlined_call_operand.hbm [shape: f32[2,128], index: 5, kind: output, shape index: {}]  }
   0x1   :  { %v22_v0 = vld [vmem:[%s390_s1] sm:$0xff]  ;;  %v23_v1 = vld [vmem:[%s390_s1 + $0x8] sm:$0xff]  ;;  %v24_v2 = vld [vmem:[%s390_s1 + $0x10] sm:$0xff]  ;;  %260 = vmatprep.subr.bf16.mxu0 %v308_v3  ;;  %246 = vmatprep.mubr.msk.f32.mxu0 %vm309_vm0, %v310_v6 }
   0x2   :  { %v261_v4 = vpack.c.bf16 %v23_v1, %v22_v0  ;;  %v25_v5 = vld [vmem:[%s390_s1 + $0x18] sm:$0xff]  ;;  %266 = vmatprep.subr.bf16.mxu1 %v308_v3  ;;  %257 = vmatprep.mubr.msk.f32.mxu1 %vm309_vm0, %v310_v6 }
   0x3   :  { %10 = vsyncpa [#allocation3], 0  ;;  %v264_v7 = vpack.c.bf16 %v25_v5, %v24_v2  ;;  %v21_v8 = vld [vmem:[%s389_s0] sm:$0x3]  ;;  %vm33_vm1 = vcmask 261120   ;;  %v109_v10 = vld [vmem:[%s392_s3 + $0x8] sm:$0xff] }
   0x4   :  { %262 = vmatpush3.bf16.msra.mxu0 %v261_v4  ;;  %v108_v9 = vld [vmem:[%s392_s3] sm:$0xff]  ;;  %v110_v11 = vld [vmem:[%s392_s3 + $0x10] sm:$0xff]  ;;  %v111_v13 = vld [vmem:[%s392_s3 + $0x18] sm:$0xff]  ;;  %vm193_vm2 = vcmask 1041408   ;;  %s311_s3 = smov [#allocation2]  }
   0x5   :  { %263 = vmatprep.subr.bf16.mxu0 %v308_v3  ;;  %v267_v12 = vpack.c.bf16 %v109_v10, %v108_v9  ;;  %v270_v14 = vpack.c.bf16 %v111_v13, %v110_v11  ;;  %v224_v15 = vld [vmem:[%s391_s2] ss:$0 sm:$0xff] }
   0x6   :  { %v226_v20 = vld [vmem:[%s393_s4] ss:$0 sm:$0xff]  ;;  %s216_s4 = sshll.u32 %s311_s3, 4  ;;  %s217_s4 = int_to_ptr.vmem [resolvable:$true] %s216_s4 }
   0x7   :  { %268 = vmatpush3.bf16.msra.mxu1 %v267_v12  ;;  %s284_s14 = scalar_lea.vmem %s217_s4, 32  ;;  %p289_p1 = scmp.lt.s32.totalorder %s217_s4, %s217_s4 }
   0x8   :  { %265 = vmatpush3.bf16.msra.mxu0 %v264_v7  ;;  %269 = vmatprep.subr.bf16.mxu1 %v308_v3  ;;  %p285_p0 = scmp.ne.s32.totalorder %s217_s4, %s284_s14  ;;  %p290_p2 = scmp.lt.s32.totalorder %s284_s14, %s284_s14 }
   0xa   :  { %p291_p3 = por %p290_p2, %p289_p1 }
   0xb   :  { %247 = vmatmul.mubr.msk.f32.vlgmr.msra.gmra.mrb[0].mxu0 %vm33_vm1, %v21_v8  ;;  %271 = vmatpush3.bf16.msra.mxu1 %v270_v14 }
   0xc   :  { %p292_p4 = pnand %p291_p3, %p285_p0 }
  0xde   :  { %v103_v16 = vpop.f32.mrb[0].mxu0 }
  0xdf   :  { %v104_v17 = vadd.f32 %v224_v15, %v103_v16  ;;  %v248_v18 = vpop.f32.mrb[1].mxu0 }
  0xe1   :  { %280 = vtanh.f32 %v104_v17 }
  0xeb   :  { %v281_v19 = vpop.eup %280 }
  0xec   :  { %258 = vmatmul.mubr.msk.f32.vlgmr.msra.gmra.mrb[0].mxu1 %vm33_vm1, %v281_v19 }
 0x1bf   :  { %v188_v21 = vpop.f32.mrb[0].mxu1 }
 0x1c0   :  { %v189_v22 = vadd.f32 %v226_v20, %v188_v21  ;;  %v259_v23 = vpop.f32.mrb[1].mxu1 }
 0x1c2   :  { %v192_v24 = vmul.f32 %v189_v22, %v189_v22 }
 0x1c4   :  { %v194_v25 = vsel %vm193_vm2, %v192_v24, 0.0 }
 0x1c5   :  { %195 = vadd.xlane.f32.xlu0 %v194_v25 }
 0x252   :  { %v196_v26 = vpop.xlane.xlu0 %195 }
 0x253   :  { %v197_v27 = vrot.slane %v196_v26, 4 }
 0x255   :  { %v198_v28 = vadd.f32 %v197_v27, %v196_v26 }
 0x257   :  { %v199_v29 = vrot.slane %v198_v28, 2 }
 0x259   :  { %v200_v30 = vadd.f32 %v199_v29, %v198_v28 }
 0x25b   :  { %v201_v31 = vrot.slane %v200_v30, 1 }
 0x25d   :  { %v202_v32 = vadd.f32 %v201_v31, %v200_v30 }
 0x25f   :  { %272 = vpush %v202_v32 }
 0x290   :  { %s273_s2 = spop %272 }
 0x291   :  { %v204_v33 = vstv %s273_s2 }
 0x292   :  { %282 = vrsqrt.f32 %v204_v33 }
 0x29c   :  { %v283_v34 = vpop.eup %282 }
 0x29d   :  { %274 = vpush %v283_v34 }
 0x2ce   :  { %s275_s13 = spop %274 }
 0x2cf   :  { %v207_v35 = vstv %s275_s13 }
 0x2d0   :  { %v208_v36 = vmul.f32 %v207_v35, %v189_v22 }
 0x2d2   :  { %209 = vst [vmem:[#allocation2] sm:$0x3] %v208_v36 }
 0x2d3   :  { %295 = shalt.err (!%p292_p4)
}
 0x2d4   :  { %s296_s17 = scalar_lea.hbm %s394_s5, 32 }
 0x2d5   :  { %p297_p5 = scmp.ne.s32.totalorder %s394_s5, %s296_s17  ;;  %p300_p6 = scmp.lt.u32.totalorder %s296_s17, %s394_s5 }
 0x2d7   :  { %p302_p7 = pnand %p300_p6, %p297_p5 }
 0x2d9   :  { %305 = shalt.err (!%p302_p7)
}
 0x2da   :  { %219 = dma.vmem_to_hbm [thread:$0]  %s217_s4, 32, %s394_s5, [#allocation3]  }
 0x2db   :  { %306 = dma.done.wait [#allocation3], 32  }
 0x2dc   :  { %307 = vsyncadd [#allocation3], 4294967264 }
 0x2dd   :  { %223 = vsyncpa [#allocation3], 1 }

</bundles_post_ra>
